<compile_context>
chip_gen: v7x
topology: tpu7x:2x2x1
jax: 0.10.0
libtpu: 0.0.40
codegen_flags: <defaults>
</compile_context>

<pallas_src>
import jax
import jax.numpy as jnp
from jax import lax
from jax.experimental import pallas as pl
from jax.experimental.pallas import tpu as pltpu

NEG_SLOPE = 0.01  # torch.nn.LeakyReLU default


def _leaky_relu(x):
    return jnp.where(x > 0, x, NEG_SLOPE * x)


def _round_up(x, m):
    return ((x + m - 1) // m) * m


def _num_tensorcores():
    """Best-effort count of TensorCores sharing a 'parallel' Pallas grid axis."""
    try:
        d = jax.devices()[0]
        if d.platform != "tpu":
            return 1
        for attr in ("num_cores", "core_count"):
            v = getattr(d, attr, None)
            if isinstance(v, int) and v > 0:
                return v
        kind = str(getattr(d, "device_kind", "")).lower()
        if "v7" in kind:
            return 2  # v7x: 2 TensorCores per chip
    except Exception:
        pass
    return 1


def _select_tiling(batch, tile_b, num_cores):
    """Pick (tile, n_tiles): tile is a multiple of 128 (or the full batch when
    a single block suffices); waste from the ragged last block is < 128 rows
    per tile.  On multi-TensorCore parts (v7x) make sure both cores get a
    balanced share of the 'parallel' grid axis."""
    tile_b = max(128, _round_up(tile_b, 128))
    n_tiles = pl.cdiv(batch, tile_b)
    if num_cores > 1 and batch >= 128 * num_cores:
        n_tiles = _round_up(max(n_tiles, num_cores), num_cores)
    if n_tiles <= 1:
        return batch, 1                      # single full-extent block, zero waste
    tile = _round_up(pl.cdiv(batch, n_tiles), 128)
    n_tiles = pl.cdiv(batch, tile)
    if n_tiles <= 1:
        return batch, 1
    return tile, n_tiles


def _vmem_limit_bytes(tile, in_size, out_size, x_dtype):
    """Explicit VMEM budget: double-buffered x block (lane-padded to 128) +
    double-buffered (out, tile) output block + weights + margin."""
    itemsize = jnp.dtype(x_dtype).itemsize
    x_buf = _round_up(tile, 8) * _round_up(in_size, 128) * itemsize
    o_buf = _round_up(out_size, 8) * _round_up(tile, 128) * 4
    weights = 256 * 1024
    need = 2 * (x_buf + o_buf) + weights
    return int(min(max(32 * 2**20, need + 4 * 2**20), 100 * 2**20))


def bc_kernel(x_ref, w1_ref, b1_ref, w2_ref, b2_ref, w3_ref, b3_ref, o_ref):
    # x_ref: (tile_b, in_size) -- natural PyTorch layout straight from HBM.
    # Compute in (features, batch) layout so the batch rides the lane axis;
    # the MXU absorbs the transpose via the contracting dims of dot_general.
    x = x_ref[...]
    dn = (((1,), (1,)), ((), ()))  # contract w1 dim1 (in) with x dim1 (in)

    # Layer 1: Linear(input_size, 7) + LeakyReLU        -> (7, tile_b)
    w1 = w1_ref[...].astype(x.dtype)
    h1 = lax.dot_general(w1, x, dn, preferred_element_type=jnp.float32)
    h1 = _leaky_relu(h1 + b1_ref[...])

    # Layer 2: Linear(7, 5) + LeakyReLU                 -> (5, tile_b)
    h2 = jnp.dot(w2_ref[...], h1, preferred_element_type=jnp.float32) + b2_ref[...]
    h2 = _leaky_relu(h2)

    # Layer 3: Linear(5, output_size)                   -> (out_size, tile_b)
    logits = jnp.dot(w3_ref[...], h2, preferred_element_type=jnp.float32) + b3_ref[...]

    # Numerically stable softmax over the class axis (sublanes).
    # Exact divide (NOT approx reciprocal) so rows sum to 1 at f32 precision.
    m = jnp.max(logits, axis=0, keepdims=True)
    e = jnp.exp(logits - m)
    denom = jnp.sum(e, axis=0, keepdims=True)
    o_ref[...] = (e / denom).astype(o_ref.dtype)


def bc_forward_t(x, params, *, tile_b=16384):
    """Forward pass; returns probabilities in (output_size, B) layout with zero
    wrapper-side copies.  x: (B, input_size); params in PyTorch layout
    (w: (out, in), b: (out, 1))."""
    B, in_size = x.shape
    out_size = params["w3"].shape[0]

    tile, n_tiles = _select_tiling(B, tile_b, _num_tensorcores())
    vlim = _vmem_limit_bytes(tile, in_size, out_size, x.dtype)

    def whole(arr):  # small weights/biases: one resident block, never re-fetched
        return pl.BlockSpec(arr.shape, lambda i: (0, 0))

    return pl.pallas_call(
        bc_kernel,
        out_shape=jax.ShapeDtypeStruct((out_size, B), jnp.float32),
        grid_spec=pltpu.PrefetchScalarGridSpec(
            num_scalar_prefetch=0,
            grid=(n_tiles,),
            in_specs=[
                pl.BlockSpec((tile, in_size), lambda i: (i, 0)),   # x rows tile
                whole(params["w1"]), whole(params["b1"]),
                whole(params["w2"]), whole(params["b2"]),
                whole(params["w3"]), whole(params["b3"]),
            ],
            out_specs=pl.BlockSpec((out_size, tile), lambda i: (0, i)),
        ),
        compiler_params=pltpu.CompilerParams(
            dimension_semantics=("parallel",),
            vmem_limit_bytes=vlim,
        ),
    )(x, params["w1"], params["b1"], params["w2"], params["b2"],
      params["w3"], params["b3"])


def bc_forward(x, params, *, tile_b=16384):
    """PyTorch-compatible forward: (B, input_size) -> (B, output_size).
    The only wrapper-side copy is this small output transpose
    (out_size * B elements, << the input stream)."""
    return bc_forward_t(x, params, tile_b=tile_b).T


def init_params(key, input_size, output_size):
    """PyTorch-style Linear init: U(-1/sqrt(fan_in), +1/sqrt(fan_in));
    weight (out, in), bias (out, 1)."""
    dims = [(input_size, 7), (7, 5), (5, output_size)]
    params = {}
    keys = jax.random.split(key, 2 * len(dims))
    for n, (fan_in, fan_out) in enumerate(dims, start=1):
        bound = 1.0 / jnp.sqrt(float(fan_in))
        params[f"w{n}"] = jax.random.uniform(
            keys[2 * (n - 1)], (fan_out, fan_in), jnp.float32, -bound, bound)
        params[f"b{n}"] = jax.random.uniform(
            keys[2 * (n - 1) + 1], (fan_out, 1), jnp.float32, -bound, bound)
    return params


def bc_reference(x, p):
    h1 = _leaky_relu(x @ p["w1"].T + p["b1"].T)
    h2 = _leaky_relu(h1 @ p["w2"].T + p["b2"].T)
    logits = h2 @ p["w3"].T + p["b3"].T
    return jax.nn.softmax(logits, axis=1)


if __name__ == "__main__":
    key = jax.random.PRNGKey(0)
    k_x, k_p, k_x2 = jax.random.split(key, 3)

    # Small shapes consistent with the module.
    batch, input_size, output_size = 8, 16, 4
    x = jax.random.normal(k_x, (batch, input_size), dtype=jnp.float32)
    params = init_params(k_p, input_size, output_size)

    out = jax.block_until_ready(bc_forward(x, params))
    ref = bc_reference(x, params)
    assert out.shape == (batch, output_size)
    assert jnp.allclose(out, ref, atol=1e-5, rtol=1e-5), "mismatch vs reference"
    assert jnp.allclose(jnp.sum(out, axis=1), 1.0, atol=1e-5), "softmax rows != 1"

    # Multi-tile path with a ragged (masked) last block: B=300, tile=128 -> 3 steps.
    b2 = 300
    x2 = jax.random.normal(k_x2, (b2, input_size), dtype=jnp.float32)
    out2 = jax.block_until_ready(bc_forward(x2, params, tile_b=128))
    ref2 = bc_reference(x2, params)
    assert out2.shape == (b2, output_size)
    assert jnp.allclose(out2, ref2, atol=1e-5, rtol=1e-5), "mismatch (tiled path)"
    assert jnp.allclose(jnp.sum(out2, axis=1), 1.0, atol=1e-5), "softmax rows != 1 (tiled)"

    print("KERNEL_OK")
</pallas_src>

<mosaic_0001>
module attributes {stable_mosaic.version = 11 : i64} {
  func.func @bc_kernel(%arg0: i32, %arg1: memref<8x16xf32, #tpu.memory_space<vmem>>, %arg2: memref<7x16xf32, #tpu.memory_space<vmem>>, %arg3: memref<7x1xf32, #tpu.memory_space<vmem>>, %arg4: memref<5x7xf32, #tpu.memory_space<vmem>>, %arg5: memref<5x1xf32, #tpu.memory_space<vmem>>, %arg6: memref<4x5xf32, #tpu.memory_space<vmem>>, %arg7: memref<4x1xf32, #tpu.memory_space<vmem>>, %arg8: memref<4x8xf32, #tpu.memory_space<vmem>>) attributes {dimension_semantics = [#tpu.dimension_semantics<parallel>], iteration_bounds = array<i64: 1>, scalar_prefetch = 0 : i64, scratch_operands = 0 : i64, tpu.core_type = #tpu.core_type<tc>, window_params = [{transform_indices = @transform_0, window_bounds = array<i64: 8, 16>}, {pipeline_mode = #tpu.pipeline_mode<synchronous>, transform_indices = @transform_1, window_bounds = array<i64: 7, 16>}, {pipeline_mode = #tpu.pipeline_mode<synchronous>, transform_indices = @transform_2, window_bounds = array<i64: 7, 1>}, {pipeline_mode = #tpu.pipeline_mode<synchronous>, transform_indices = @transform_3, window_bounds = array<i64: 5, 7>}, {pipeline_mode = #tpu.pipeline_mode<synchronous>, transform_indices = @transform_4, window_bounds = array<i64: 5, 1>}, {pipeline_mode = #tpu.pipeline_mode<synchronous>, transform_indices = @transform_5, window_bounds = array<i64: 4, 5>}, {pipeline_mode = #tpu.pipeline_mode<synchronous>, transform_indices = @transform_6, window_bounds = array<i64: 4, 1>}, {transform_indices = @transform_7, window_bounds = array<i64: 4, 8>}]} {
    %c0 = arith.constant 0 : index
    %c0_0 = arith.constant 0 : index
    %0 = vector.load %arg1[%c0, %c0_0] : memref<8x16xf32, #tpu.memory_space<vmem>>, vector<8x16xf32>
    %c0_1 = arith.constant 0 : index
    %c0_2 = arith.constant 0 : index
    %1 = vector.load %arg2[%c0_1, %c0_2] : memref<7x16xf32, #tpu.memory_space<vmem>>, vector<7x16xf32>
    %cst = arith.constant dense<0.000000e+00> : vector<7x8xf32>
    %2 = tpu.matmul %1, %0, %cst {dimension_numbers = #tpu.dot_dimension_numbers<[1], [1], [0], [0], [0, 0, 1, 0], [], []>} : vector<7x16xf32>, vector<8x16xf32>, vector<7x8xf32> -> vector<7x8xf32>
    %c0_3 = arith.constant 0 : index
    %c0_4 = arith.constant 0 : index
    %3 = vector.load %arg3[%c0_3, %c0_4] : memref<7x1xf32, #tpu.memory_space<vmem>>, vector<7x1xf32>
    %4 = vector.broadcast %3 : vector<7x1xf32> to vector<7x8xf32>
    %5 = arith.addf %2, %4 : vector<7x8xf32>
    %cst_5 = arith.constant 0.000000e+00 : f32
    %6 = vector.broadcast %cst_5 : f32 to vector<7x8xf32>
    %7 = arith.cmpf ogt, %5, %6 : vector<7x8xf32>
    %cst_6 = arith.constant 0.00999999977 : f32
    %8 = vector.broadcast %cst_6 : f32 to vector<7x8xf32>
    %9 = arith.mulf %8, %5 : vector<7x8xf32>
    %10 = arith.select %7, %5, %9 : vector<7x8xi1>, vector<7x8xf32>
    %c0_7 = arith.constant 0 : index
    %c0_8 = arith.constant 0 : index
    %11 = vector.load %arg4[%c0_7, %c0_8] : memref<5x7xf32, #tpu.memory_space<vmem>>, vector<5x7xf32>
    %cst_9 = arith.constant dense<0.000000e+00> : vector<5x8xf32>
    %12 = tpu.matmul %11, %10, %cst_9 {dimension_numbers = #tpu.dot_dimension_numbers<[1], [0], [0], [1], [0, 0, 1, 1], [], []>} : vector<5x7xf32>, vector<7x8xf32>, vector<5x8xf32> -> vector<5x8xf32>
    %c0_10 = arith.constant 0 : index
    %c0_11 = arith.constant 0 : index
    %13 = vector.load %arg5[%c0_10, %c0_11] : memref<5x1xf32, #tpu.memory_space<vmem>>, vector<5x1xf32>
    %14 = vector.broadcast %13 : vector<5x1xf32> to vector<5x8xf32>
    %15 = arith.addf %12, %14 : vector<5x8xf32>
    %cst_12 = arith.constant 0.000000e+00 : f32
    %16 = vector.broadcast %cst_12 : f32 to vector<5x8xf32>
    %17 = arith.cmpf ogt, %15, %16 : vector<5x8xf32>
    %cst_13 = arith.constant 0.00999999977 : f32
    %18 = vector.broadcast %cst_13 : f32 to vector<5x8xf32>
    %19 = arith.mulf %18, %15 : vector<5x8xf32>
    %20 = arith.select %17, %15, %19 : vector<5x8xi1>, vector<5x8xf32>
    %c0_14 = arith.constant 0 : index
    %c0_15 = arith.constant 0 : index
    %21 = vector.load %arg6[%c0_14, %c0_15] : memref<4x5xf32, #tpu.memory_space<vmem>>, vector<4x5xf32>
    %cst_16 = arith.constant dense<0.000000e+00> : vector<4x8xf32>
    %22 = tpu.matmul %21, %20, %cst_16 {dimension_numbers = #tpu.dot_dimension_numbers<[1], [0], [0], [1], [0, 0, 1, 1], [], []>} : vector<4x5xf32>, vector<5x8xf32>, vector<4x8xf32> -> vector<4x8xf32>
    %c0_17 = arith.constant 0 : index
    %c0_18 = arith.constant 0 : index
    %23 = vector.load %arg7[%c0_17, %c0_18] : memref<4x1xf32, #tpu.memory_space<vmem>>, vector<4x1xf32>
    %24 = vector.broadcast %23 : vector<4x1xf32> to vector<4x8xf32>
    %25 = arith.addf %22, %24 : vector<4x8xf32>
    %cst_19 = arith.constant dense<0xFF800000> : vector<8xf32>
    %26 = vector.multi_reduction <maximumf>, %25, %cst_19 [0] : vector<4x8xf32> to vector<8xf32>
    %27 = vector.shape_cast %26 : vector<8xf32> to vector<1x8xf32>
    %28 = vector.broadcast %27 : vector<1x8xf32> to vector<4x8xf32>
    %29 = arith.subf %25, %28 : vector<4x8xf32>
    %30 = math.exp %29 : vector<4x8xf32>
    %cst_20 = arith.constant dense<0.000000e+00> : vector<8xf32>
    %31 = vector.multi_reduction <add>, %30, %cst_20 [0] : vector<4x8xf32> to vector<8xf32>
    %32 = vector.shape_cast %31 : vector<8xf32> to vector<1x8xf32>
    %33 = vector.broadcast %32 : vector<1x8xf32> to vector<4x8xf32>
    %34 = arith.divf %30, %33 : vector<4x8xf32>
    %c0_21 = arith.constant 0 : index
    %c0_22 = arith.constant 0 : index
    %35 = vector.load %arg8[%c0_21, %c0_22] : memref<4x8xf32, #tpu.memory_space<vmem>>, vector<4x8xf32>
    tpu.vector_store %arg8[%c0_21, %c0_22], %34 {strides = array<i32>} : memref<4x8xf32, #tpu.memory_space<vmem>>, vector<4x8xf32>,
    return
  }
  func.func @transform_0(%arg0: i32) -> (i32, i32) {
    %c0_i32 = arith.constant 0 : i32
    %c0_i32_0 = arith.constant 0 : i32
    return %arg0, %c0_i32 : i32, i32
  }
  func.func @transform_1(%arg0: i32) -> (i32, i32) {
    %c0_i32 = arith.constant 0 : i32
    %c0_i32_0 = arith.constant 0 : i32
    %c0_i32_1 = arith.constant 0 : i32
    return %c0_i32, %c0_i32_0 : i32, i32
  }
  func.func @transform_2(%arg0: i32) -> (i32, i32) {
    %c0_i32 = arith.constant 0 : i32
    %c0_i32_0 = arith.constant 0 : i32
    %c0_i32_1 = arith.constant 0 : i32
    return %c0_i32, %c0_i32_0 : i32, i32
  }
  func.func @transform_3(%arg0: i32) -> (i32, i32) {
    %c0_i32 = arith.constant 0 : i32
    %c0_i32_0 = arith.constant 0 : i32
    %c0_i32_1 = arith.constant 0 : i32
    return %c0_i32, %c0_i32_0 : i32, i32
  }
  func.func @transform_4(%arg0: i32) -> (i32, i32) {
    %c0_i32 = arith.constant 0 : i32
    %c0_i32_0 = arith.constant 0 : i32
    %c0_i32_1 = arith.constant 0 : i32
    return %c0_i32, %c0_i32_0 : i32, i32
  }
  func.func @transform_5(%arg0: i32) -> (i32, i32) {
    %c0_i32 = arith.constant 0 : i32
    %c0_i32_0 = arith.constant 0 : i32
    %c0_i32_1 = arith.constant 0 : i32
    return %c0_i32, %c0_i32_0 : i32, i32
  }
  func.func @transform_6(%arg0: i32) -> (i32, i32) {
    %c0_i32 = arith.constant 0 : i32
    %c0_i32_0 = arith.constant 0 : i32
    %c0_i32_1 = arith.constant 0 : i32
    return %c0_i32, %c0_i32_0 : i32, i32
  }
  func.func @transform_7(%arg0: i32) -> (i32, i32) {
    %c0_i32 = arith.constant 0 : i32
    %c0_i32_0 = arith.constant 0 : i32
    return %c0_i32, %arg0 : i32, i32
  }
}

</mosaic_0001>

<bundles_post_ra>
// kernel: tpu_custom_call.1
= control target key start
LH: loop header
LB: loop body
LE: loop exit
PB: predicated region body
PF: predicated region fallthrough
CT: control target
= control target key end

     0   :  { %vm35_vm0 = vcmask 130048   ;;  %v384_v1 = vmov 0.0   ;;  %vm385_vm1 = vmmov 0   ;;  %v386_v4 = vmov 0   ;;  %s469_s0 = inlined_call_operand.vmem [shape: f32[8,16], index: 0, kind: input, shape index: {}]   ;;  %s470_s1 = inlined_call_operand.vmem [shape: f32[7,16], index: 1, kind: input, shape index: {}]   ;;  %s471_s2 = inlined_call_operand.vmem [shape: f32[7,1], index: 2, kind: input, shape index: {}]   ;;  %s472_s3 = inlined_call_operand.vmem [shape: f32[5,7], index: 3, kind: input, shape index: {}]   ;;  %s473_s4 = inlined_call_operand.vmem [shape: f32[5,1], index: 4, kind: input, shape index: {}]   ;;  %s474_s5 = inlined_call_operand.vmem [shape: f32[4,5], index: 5, kind: input, shape index: {}]   ;;  %s475_s6 = inlined_call_operand.vmem [shape: f32[4,1], index: 6, kind: input, shape index: {}]   ;;  %s476_s7 = inlined_call_operand.hbm [shape: f32[4,8], index: 7, kind: output, shape index: {}]  }
   0x1   :  { %v27_v0 = vld [vmem:[%s469_s0] sm:$0xff]  ;;  %335 = vmatprep.subr.mxu0 %v384_v1  ;;  %337 = vmatprep.mubr.msk.f32.mxu0 %vm385_vm1, %v384_v1 }
   0x2   :  { %v29_v2 = vld [vmem:[%s471_s2] sm:$0x7f]  ;;  %336 = vmatpush3.xpose.msk.msra.mxu0 %vm35_vm0, %v27_v0  ;;  %354 = vset.pattern.permute.xlu0 %v386_v4 }
   0x3   :  { %v28_v3 = vld [vmem:[%s470_s1] sm:$0x7f] }
   0x4   :  { %12 = vsyncpa [#allocation3], 0  ;;  %32 = vperm.xlu0 %354, %v29_v2   ;;  %340 = vmatprep.subr.mxu1 %v384_v1  ;;  %v116_v5 = vld [vmem:[%s473_s4] sm:$0x1f]  ;;  %vm126_vm3 = vcmask 1046528   ;;  %vm122_vm4 = vcmask 56320  }
   0x5   :  { %342 = vmatprep.mubr.msk.f32.mxu1 %vm385_vm1, %v384_v1  ;;  %355 = vset.pattern.permute.xlu1 %v386_v4  ;;  %v115_v11 = vld [vmem:[%s472_s3] sm:$0x1f]  ;;  %vm214_vm6 = vcmask 1044480   ;;  %vm210_vm7 = vcmask 39936   ;;  %vm288_vm8 = vcmask 60416  }
   0x6   :  { %338 = vmatmul.mubr.msk.f32.vlgmr.msra.gmra.mrb[0].mxu0 %vm35_vm0, %v28_v3  ;;  %v204_v13 = vld [vmem:[%s475_s6] sm:$0xf] }
   0x7   :  { %207 = vperm.xlu1 %355, %v204_v13   ;;  %v203_v19 = vld [vmem:[%s474_s5] sm:$0xf]  ;;  %s387_s5 = smov [#allocation2]  }
   0x8   :  { %119 = vperm.xlu0 %354, %v116_v5   ;;  %s315_s6 = sshll.u32 %s387_s5, 4  ;;  %s316_s6 = int_to_ptr.vmem [resolvable:$true] %s315_s6 }
   0x9   :  { %s360_s10 = scalar_lea.vmem %s316_s6, 64  ;;  %p365_p1 = scmp.lt.s32.totalorder %s316_s6, %s316_s6 }
   0xa   :  { %p361_p0 = scmp.ne.s32.totalorder %s316_s6, %s360_s10  ;;  %p366_p2 = scmp.lt.s32.totalorder %s360_s10, %s360_s10 }
   0xc   :  { %p367_p3 = por %p366_p2, %p365_p1 }
   0xe   :  { %p368_p4 = pnand %p367_p3, %p361_p0 }
  0x83   :  { %v33_v6 = vpop.permute.xlu0 %32 }
  0x86   :  { %v208_v21 = vpop.permute.xlu1 %207 }
  0x87   :  { %v120_v14 = vpop.permute.xlu0 %119 }
  0xd9   :  { %v108_v7 = vpop.f32.mrb[0].mxu0 }
  0xda   :  { %v109_v8 = vadd.f32 %v108_v7, %v33_v6  ;;  %v339_v9 = vpop.f32.mrb[1].mxu0 }
  0xdc   :  { %v113_v10 = vmul.f32 0.01, %v109_v8  ;;  %vm112_vm2 = vcmp.gt.f32.partialorder %v109_v8, 0.0 }
  0xde   :  { %v114_v12 = vsel %vm112_vm2, %v109_v8, %v113_v10 }
  0xdf   :  { %341 = vmatpush3.msk.msra.mxu1 %vm126_vm3, %v114_v12 }
  0xe0   :  { %343 = vmatmul.mubr.msk.f32.vlgmr.msra.gmra.mrb[0].mxu1 %vm122_vm4, %v115_v11  ;;  %345 = vmatprep.subr.mxu1 %v384_v1 }
  0xe1   :  { %347 = vmatprep.mubr.msk.f32.mxu1 %vm385_vm1, %v384_v1 }
 0x1b3   :  { %v196_v15 = vpop.f32.mrb[0].mxu1 }
 0x1b4   :  { %v197_v16 = vadd.f32 %v196_v15, %v120_v14  ;;  %v344_v17 = vpop.f32.mrb[1].mxu1 }
 0x1b6   :  { %vm200_vm5 = vcmp.gt.f32.partialorder %v197_v16, 0.0  ;;  %v201_v18 = vmul.f32 0.01, %v197_v16 }
 0x1b8   :  { %v202_v20 = vsel %vm200_vm5, %v197_v16, %v201_v18 }
 0x1b9   :  { %346 = vmatpush3.msk.msra.mxu1 %vm214_vm6, %v202_v20 }
 0x1ba   :  { %348 = vmatmul.mubr.msk.f32.vlgmr.msra.gmra.mrb[2].mxu1 %vm210_vm7, %v203_v19 }
 0x28d   :  { %v284_v22 = vpop.f32.mrb[2].mxu1 }
 0x28e   :  { %v285_v23 = vadd.f32 %v284_v22, %v208_v21  ;;  %v349_v24 = vpop.f32.mrb[3].mxu1 }
 0x290   :  { %v289_v25 = vsel %vm288_vm8, %v285_v23, -inf }
 0x291   :  { %v290_v26 = vrot.slane %v289_v25, 4 }
 0x293   :  { %v291_v27 = vmax.f32 %v289_v25, %v290_v26 }
 0x295   :  { %v292_v28 = vrot.slane %v291_v27, 2 }
 0x297   :  { %v293_v29 = vmax.f32 %v291_v27, %v292_v28 }
 0x299   :  { %v294_v30 = vrot.slane %v293_v29, 1 }
 0x29b   :  { %v295_v31 = vmax.f32 %v293_v29, %v294_v30 }
 0x29d   :  { %v296_v32 = vsub.f32 %v285_v23, %v295_v31 }
 0x29f   :  { %v297_v33 = vmul.f32 1.442695, %v296_v32 }
 0x2a1   :  { %356 = vpow2.f32 %v297_v33 }
 0x2ab   :  { %v357_v34 = vpop.eup %356 }
 0x2ac   :  { %v299_v35 = vsel %vm288_vm8, %v357_v34, 0.0 }
 0x2ad   :  { %v300_v36 = vrot.slane %v299_v35, 4 }
 0x2af   :  { %v301_v37 = vadd.f32 %v300_v36, %v299_v35 }
 0x2b1   :  { %v302_v38 = vrot.slane %v301_v37, 2 }
 0x2b3   :  { %v303_v39 = vadd.f32 %v302_v38, %v301_v37 }
 0x2b5   :  { %v304_v40 = vrot.slane %v303_v39, 1 }
 0x2b7   :  { %v305_v41 = vadd.f32 %v304_v40, %v303_v39 }
 0x2b9   :  { %358 = vrcp.f32 %v305_v41 }
 0x2c3   :  { %v359_v42 = vpop.eup %358 }
 0x2c4   :  { %v307_v43 = vmul.f32 %v359_v42, %v357_v34 }
 0x2c6   :  { %308 = vst.msk [vmem:[#allocation2] sm:$0xf] %vm288_vm8, %v307_v43 }
 0x2c7   :  { %371 = shalt.err (!%p368_p4)
}
 0x2c8   :  { %s372_s13 = scalar_lea.hbm %s476_s7, 64 }
 0x2c9   :  { %p373_p5 = scmp.ne.s32.totalorder %s476_s7, %s372_s13  ;;  %p376_p6 = scmp.lt.u32.totalorder %s372_s13, %s476_s7 }
 0x2cb   :  { %p378_p7 = pnand %p376_p6, %p373_p5 }
 0x2cd   :  { %381 = shalt.err (!%p378_p7)
}
 0x2ce   :  { %318 = dma.vmem_to_hbm [thread:$0]  %s316_s6, 64, %s476_s7, [#allocation3]  }
 0x2cf   :  { %382 = dma.done.wait [#allocation3], 64  }
 0x2d0   :  { %383 = vsyncadd [#allocation3], 4294967232 }
 0x2d1   :  { %322 = vsyncpa [#allocation3], 1 }

</bundles_post_ra>
